<compile_context>
chip_gen: v7x
topology: tpu7x:2x2x1
jax: 0.10.0
libtpu: 0.0.40
codegen_flags: <defaults>
</compile_context>

<pallas_src>
from functools import partial

import jax
import jax.numpy as jnp
from jax.experimental import pallas as pl
from jax.experimental.pallas import tpu as pltpu


def rw_kernel(x_ref, x1_ref, zz_ref, out_ref, *, TA, B, M, N, N_pad):
    MN = M * N
    C = x_ref.shape[-1]

    x = x_ref[...].reshape(TA * B, C)      # (TA*B, C): TA graphs stacked along rows
    x1 = x1_ref[...].reshape(TA * B, C)
    z = zz_ref[0]                          # (C, MN)  step-0 filters, lanes = (m, n)
    z1 = zz_ref[1]                         # (C, MN)  step-1 filters (pre-propagated)

    # One MXU matmul per step for ALL M filters and TA graphs at once.
    zx = jnp.dot(x, z, preferred_element_type=jnp.float32)     # (TA*B, MN)
    t1 = jnp.dot(x1, z1, preferred_element_type=jnp.float32)   # (TA*B, MN)

    # zx*t0 + zx*t1 with t0 == zx  ->  zx * (zx + t1)   (one fewer VPU multiply)
    p = zx * (zx + t1)

    # Per-graph reduction over the B node rows.
    q = jnp.sum(p.reshape(TA, B, MN), axis=1)                   # (TA, MN)

    # Fold the (m, n) lane axis back onto n and reduce over m with a tiny selection
    # matmul.  sel is zero for padded lanes n >= N, so the stored slab is lane-dense
    # (N_pad is a multiple of 128) with exact zeros in the padding.
    k_idx = jax.lax.broadcasted_iota(jnp.int32, (MN, N_pad), 0)
    n_idx = jax.lax.broadcasted_iota(jnp.int32, (MN, N_pad), 1)
    sel = (k_idx % N == n_idx).astype(jnp.float32)              # (MN, N_pad)
    out = jnp.dot(q, sel, preferred_element_type=jnp.float32)   # (TA, N_pad)

    # mean over (M, B) for each of the max_step=2 terms, then average over steps
    out_ref[...] = out * (1.0 / (2.0 * M * B))


def _graphs_per_step(A):
    # Batch graphs per grid step to amortize the ~0.35us/step overhead, but keep
    # >= 2 grid steps so the "parallel" axis can shard across v7x's 2 TensorCores.
    if A <= 1:
        return 1
    return min(8, max(1, A // 2))


def rw_layer_forward(adj, features, idxs, features_hidden, adj_hidden):
    """hidden_dim=None variant of RW_layer.forward (eval mode)."""
    M, C, N = features_hidden.shape
    A, B, _ = adj.shape

    # ---- glue (plain JAX): parameter preprocessing, batch-independent ----
    iu = jnp.triu_indices(M, k=1)
    ahn = jnp.zeros((M, M, N), jnp.float32).at[iu[0], iu[1], :].set(
        jax.nn.relu(adj_hidden))
    adj_hidden_norm = ahn + jnp.transpose(ahn, (1, 0, 2))            # (M, M, N)

    z = features_hidden.astype(jnp.float32)                          # (M, C, N)
    z1 = jnp.einsum('abd,bcd->acd', adj_hidden_norm, z)              # (M, C, N)

    x = features[idxs].astype(jnp.float32)                           # (A, B, C)
    # Step-1 node propagation hoisted out of the kernel: one batched XLA op, and
    # `adj` never has to be DMA'd into the kernel at all.
    x1 = jnp.einsum('abc,acd->abd', adj.astype(jnp.float32), x)      # (A, B, C)
    # TODO(synk): dropout (p=0.5, training mode) is stochastic; implemented as identity (eval).

    # Flatten the graph-filter axis into matmul lanes: (M, C, N) -> (C, M*N).
    MN = M * N
    z_flat = jnp.transpose(z, (1, 0, 2)).reshape(C, MN)
    z1_flat = jnp.transpose(z1, (1, 0, 2)).reshape(C, MN)
    z_both = jnp.stack([z_flat, z1_flat], axis=0)                    # (2, C, MN)
    # NOTE: for MXU-bound sizes (large A*B) cast x/x1/z_both to bfloat16 here (keep
    # preferred_element_type=f32 in the kernel) — big win on v5e; kept f32 so the
    # self-check below holds tight tolerances.

    # Batch TA graphs per grid step; zero-pad A so the grid divides evenly.
    TA = _graphs_per_step(A)
    G = -(-A // TA)
    A_pad = G * TA
    if A_pad != A:
        pad = ((0, A_pad - A), (0, 0), (0, 0))
        x = jnp.pad(x, pad)
        x1 = jnp.pad(x1, pad)

    N_pad = -(-N // 128) * 128                                       # lane-dense output slab

    kernel = partial(rw_kernel, TA=TA, B=B, M=M, N=N, N_pad=N_pad)
    out = pl.pallas_call(
        kernel,
        out_shape=jax.ShapeDtypeStruct((G, TA, N_pad), jnp.float32),
        grid_spec=pltpu.PrefetchScalarGridSpec(
            num_scalar_prefetch=0,
            grid=(G,),
            in_specs=[
                pl.BlockSpec((TA, B, C), lambda g: (g, 0, 0)),       # x   (step 0)
                pl.BlockSpec((TA, B, C), lambda g: (g, 0, 0)),       # x1  (step 1)
                pl.BlockSpec((2, C, MN), lambda g: (0, 0, 0)),       # [z, z1] grid-invariant
            ],
            out_specs=pl.BlockSpec((pl.Squeezed(), TA, N_pad),
                                   lambda g: (g, 0, 0)),
        ),
        compiler_params=pltpu.CompilerParams(
            dimension_semantics=("parallel",)),
    )(x, x1, z_both)

    return out[:, :, :N].reshape(A_pad, N)[:A]                       # (A, N)


def rw_layer_reference(adj, features, idxs, features_hidden, adj_hidden):
    """Pure-JAX mirror of the torch forward (eval mode) for validation."""
    M, C, N = features_hidden.shape
    iu = jnp.triu_indices(M, k=1)
    ahn = jnp.zeros((M, M, N), jnp.float32).at[iu[0], iu[1], :].set(
        jax.nn.relu(adj_hidden))
    adj_hidden_norm = ahn + jnp.transpose(ahn, (1, 0, 2))
    z = features_hidden
    x = features[idxs].astype(jnp.float32)
    zx = jnp.einsum('mcn,abc->ambn', z, x)
    # step 0: eye @ z == z
    t0 = jnp.einsum('mcn,abc->ambn', z, x)
    # step 1
    x1 = jnp.einsum('abc,acd->abd', adj, x)
    z1 = jnp.einsum('abd,bcd->acd', adj_hidden_norm, z)
    t1 = jnp.einsum('mcn,abc->ambn', z1, x1)
    term0 = jnp.mean(zx * t0, axis=(1, 2))
    term1 = jnp.mean(zx * t1, axis=(1, 2))
    return (term0 + term1) / 2.0


if __name__ == "__main__":
    key = jax.random.PRNGKey(0)
    M = 10      # size_graph_filter
    C = 16      # input_dim  (hidden_dim=None)
    N = 8       # output_dim
    A = 2       # number of graphs in batch
    B = 8       # nodes per graph
    n_nodes = 20

    k1, k2, k3, k4, k5 = jax.random.split(key, 5)
    features = jax.random.normal(k1, (n_nodes, C), jnp.float32)
    adj = jax.random.uniform(k2, (A, B, B), jnp.float32)
    idxs = jax.random.randint(k3, (A, B), 0, n_nodes)

    # deterministic "init_weights": adj_hidden ~ U(-1,1), features_hidden ~ U(0,1)
    adj_hidden = jax.random.uniform(
        k4, (M * (M - 1) // 2, N), jnp.float32, -1.0, 1.0)
    features_hidden = jax.random.uniform(
        k5, (M, C, N), jnp.float32, 0.0, 1.0)

    out = rw_layer_forward(adj, features, idxs, features_hidden, adj_hidden)
    out = jax.block_until_ready(out)

    ref = rw_layer_reference(adj, features, idxs, features_hidden, adj_hidden)
    assert out.shape == (A, N), out.shape
    assert jnp.allclose(out, ref, rtol=1e-4, atol=1e-4), (out, ref)
    print("KERNEL_OK")
</pallas_src>

<mosaic_0001>
module attributes {stable_mosaic.version = 11 : i64} {
  func.func @rw_kernel(%arg0: i32, %arg1: memref<1x8x16xf32, #tpu.memory_space<vmem>>, %arg2: memref<1x8x16xf32, #tpu.memory_space<vmem>>, %arg3: memref<2x16x80xf32, #tpu.memory_space<vmem>>, %arg4: memref<1x1x128xf32, #tpu.memory_space<vmem>>) attributes {dimension_semantics = [#tpu.dimension_semantics<parallel>], iteration_bounds = array<i64: 2>, scalar_prefetch = 0 : i64, scratch_operands = 0 : i64, tpu.core_type = #tpu.core_type<tc>, window_params = [{transform_indices = @transform_0, window_bounds = array<i64: 1, 8, 16>}, {transform_indices = @transform_1, window_bounds = array<i64: 1, 8, 16>}, {pipeline_mode = #tpu.pipeline_mode<synchronous>, transform_indices = @transform_2, window_bounds = array<i64: 2, 16, 80>}, {transform_indices = @transform_3, window_bounds = array<i64: 1, 1, 128>}]} {
    %c0 = arith.constant 0 : index
    %c0_0 = arith.constant 0 : index
    %c0_1 = arith.constant 0 : index
    %0 = vector.load %arg1[%c0, %c0_0, %c0_1] : memref<1x8x16xf32, #tpu.memory_space<vmem>>, vector<1x8x16xf32>
    %1 = vector.shape_cast %0 : vector<1x8x16xf32> to vector<8x16xf32>
    %c0_2 = arith.constant 0 : index
    %c0_3 = arith.constant 0 : index
    %c0_4 = arith.constant 0 : index
    %2 = vector.load %arg2[%c0_2, %c0_3, %c0_4] : memref<1x8x16xf32, #tpu.memory_space<vmem>>, vector<1x8x16xf32>
    %3 = vector.shape_cast %2 : vector<1x8x16xf32> to vector<8x16xf32>
    %c0_5 = arith.constant 0 : index
    %c0_6 = arith.constant 0 : index
    %c0_7 = arith.constant 0 : index
    %4 = vector.load %arg3[%c0_5, %c0_6, %c0_7] : memref<2x16x80xf32, #tpu.memory_space<vmem>>, vector<1x16x80xf32>
    %5 = vector.shape_cast %4 : vector<1x16x80xf32> to vector<16x80xf32>
    %c1 = arith.constant 1 : index
    %c0_8 = arith.constant 0 : index
    %c0_9 = arith.constant 0 : index
    %6 = vector.load %arg3[%c1, %c0_8, %c0_9] : memref<2x16x80xf32, #tpu.memory_space<vmem>>, vector<1x16x80xf32>
    %7 = vector.shape_cast %6 : vector<1x16x80xf32> to vector<16x80xf32>
    %cst = arith.constant dense<0.000000e+00> : vector<8x80xf32>
    %8 = tpu.matmul %1, %5, %cst {dimension_numbers = #tpu.dot_dimension_numbers<[1], [0], [0], [1], [0, 0, 1, 1], [], []>} : vector<8x16xf32>, vector<16x80xf32>, vector<8x80xf32> -> vector<8x80xf32>
    %cst_10 = arith.constant dense<0.000000e+00> : vector<8x80xf32>
    %9 = tpu.matmul %3, %7, %cst_10 {dimension_numbers = #tpu.dot_dimension_numbers<[1], [0], [0], [1], [0, 0, 1, 1], [], []>} : vector<8x16xf32>, vector<16x80xf32>, vector<8x80xf32> -> vector<8x80xf32>
    %10 = arith.addf %8, %9 : vector<8x80xf32>
    %11 = arith.mulf %8, %10 : vector<8x80xf32>
    %12 = vector.shape_cast %11 : vector<8x80xf32> to vector<1x8x80xf32>
    %cst_11 = arith.constant dense<0.000000e+00> : vector<1x80xf32>
    %13 = vector.multi_reduction <add>, %12, %cst_11 [1] : vector<1x8x80xf32> to vector<1x80xf32>
    %14 = tpu.iota {dimensions = array<i32: 0>} : vector<80x128xi32>
    %15 = tpu.iota {dimensions = array<i32: 1>} : vector<80x128xi32>
    %c8_i32 = arith.constant 8 : i32
    %c0_i32 = arith.constant 0 : i32
    %16 = arith.cmpi eq, %c8_i32, %c0_i32 : i32
    %c1_i32 = arith.constant 1 : i32
    %17 = arith.select %16, %c1_i32, %c8_i32 : i32
    %18 = vector.broadcast %17 : i32 to vector<80x128xi32>
    %19 = arith.remsi %14, %18 : vector<80x128xi32>
    %c0_i32_12 = arith.constant 0 : i32
    %20 = vector.broadcast %c0_i32_12 : i32 to vector<80x128xi32>
    %21 = arith.cmpi ne, %19, %20 : vector<80x128xi32>
    %c0_i32_13 = arith.constant 0 : i32
    %22 = vector.broadcast %c0_i32_13 : i32 to vector<80x128xi32>
    %23 = arith.cmpi slt, %19, %22 : vector<80x128xi32>
    %c0_i32_14 = arith.constant 0 : i32
    %24 = arith.cmpi slt, %17, %c0_i32_14 : i32
    %25 = vector.broadcast %24 : i1 to vector<80x128xi1>
    %26 = vector.broadcast %25 : vector<80x128xi1> to vector<80x128xi1>
    %27 = arith.xori %23, %26 : vector<80x128xi1>
    %28 = arith.andi %27, %21 : vector<80x128xi1>
    %29 = vector.broadcast %17 : i32 to vector<80x128xi32>
    %30 = arith.addi %19, %29 : vector<80x128xi32>
    %31 = arith.select %28, %30, %19 : vector<80x128xi1>, vector<80x128xi32>
    %32 = arith.cmpi eq, %31, %15 : vector<80x128xi32>
    %33 = arith.extui %32 : vector<80x128xi1> to vector<80x128xi32>
    %34 = arith.sitofp %33 : vector<80x128xi32> to vector<80x128xf32>
    %cst_15 = arith.constant dense<0.000000e+00> : vector<1x128xf32>
    %35 = tpu.matmul %13, %34, %cst_15 {dimension_numbers = #tpu.dot_dimension_numbers<[1], [0], [0], [1], [0, 0, 1, 1], [], []>} : vector<1x80xf32>, vector<80x128xf32>, vector<1x128xf32> -> vector<1x128xf32>
    %cst_16 = arith.constant 6.250000e-03 : f32
    %36 = vector.broadcast %cst_16 : f32 to vector<1x128xf32>
    %37 = arith.mulf %35, %36 : vector<1x128xf32>
    %c0_17 = arith.constant 0 : index
    %c0_18 = arith.constant 0 : index
    %c0_19 = arith.constant 0 : index
    %38 = vector.load %arg4[%c0_17, %c0_18, %c0_19] : memref<1x1x128xf32, #tpu.memory_space<vmem>>, vector<1x1x128xf32>
    %39 = vector.shape_cast %38 : vector<1x1x128xf32> to vector<1x128xf32>
    %40 = vector.shape_cast %37 : vector<1x128xf32> to vector<1x1x128xf32>
    tpu.vector_store %arg4[%c0_17, %c0_18, %c0_19], %40 {strides = array<i32>} : memref<1x1x128xf32, #tpu.memory_space<vmem>>, vector<1x1x128xf32>,
    return
  }
  func.func @transform_0(%arg0: i32) -> (i32, i32, i32) {
    %c0_i32 = arith.constant 0 : i32
    %c0_i32_0 = arith.constant 0 : i32
    %c0_i32_1 = arith.constant 0 : i32
    return %arg0, %c0_i32, %c0_i32_0 : i32, i32, i32
  }
  func.func @transform_1(%arg0: i32) -> (i32, i32, i32) {
    %c0_i32 = arith.constant 0 : i32
    %c0_i32_0 = arith.constant 0 : i32
    %c0_i32_1 = arith.constant 0 : i32
    return %arg0, %c0_i32, %c0_i32_0 : i32, i32, i32
  }
  func.func @transform_2(%arg0: i32) -> (i32, i32, i32) {
    %c0_i32 = arith.constant 0 : i32
    %c0_i32_0 = arith.constant 0 : i32
    %c0_i32_1 = arith.constant 0 : i32
    %c0_i32_2 = arith.constant 0 : i32
    return %c0_i32, %c0_i32_0, %c0_i32_1 : i32, i32, i32
  }
  func.func @transform_3(%arg0: i32) -> (i32, i32, i32) {
    %c0_i32 = arith.constant 0 : i32
    %c0_i32_0 = arith.constant 0 : i32
    %c0_i32_1 = arith.constant 0 : i32
    return %arg0, %c0_i32, %c0_i32_0 : i32, i32, i32
  }
}

</mosaic_0001>

<bundles_post_ra>
// kernel: tpu_custom_call.1
= control target key start
LH: loop header
LB: loop body
LE: loop exit
PB: predicated region body
PF: predicated region fallthrough
CT: control target
= control target key end

     0   :  { %8 = vsyncpa [#allocation3], 0  ;;  %s1365_s0 = inlined_call_operand.hbm [shape: f32[2,8,16], index: 0, kind: input, shape index: {}]   ;;  %s1366_s1 = inlined_call_operand.hbm [shape: f32[2,8,16], index: 1, kind: input, shape index: {}]   ;;  %s1367_s2 = inlined_call_operand.hbm [shape: f32[2,16,80], index: 2, kind: input, shape index: {}]   ;;  %s1368_s3 = inlined_call_operand.hbm [shape: f32[2,1,128], index: 3, kind: output, shape index: {}]  }
   0x1   :  { %10 = vsyncpa [#allocation3 + $0x1], 0 }
   0x2   :  { %11 = vsyncpa [#allocation6], 0 }
   0x3   :  { %13 = vsyncpa [#allocation6 + $0x1], 0 }
   0x4   :  { %14 = vsyncpa [#allocation4], 0 }
   0x5   :  { %16 = vsyncpa [#allocation4 + $0x1], 0  ;;  %s1124_s12 = smov 0   ;;  %s1126_s13 = smov 0  }
   0x6   :  { %s1128_s14 = smov 0   ;;  %s1130_s15 = smov 0  }
   0x7 LB: > { %s1145_s16 = sadd.s32 4294967295, %s1092_s15   ;;  %s749_s17 = sadd.s32 4294967294, %s1092_s15   ;;  %s1092_s15 = sphi %s1130_s15, %s1390_s15   ;;  %s1088_s14 = sphi %s1128_s14, %s1389_s14   ;;  %s1084_s13 = sphi %s1126_s13, %s1388_s13   ;;  %s1080_s12 = sphi %s1124_s12, %s1387_s12  }
   0x8   : > { %p42_p0 = scmp.ne.s32.totalorder %s1084_s13, %s1080_s12  ;;  %p1369_p1 = scmp.eq.s32.totalorder %s1145_s16, 0 }
   0x9   : > { %p119_p3 = scmp.eq.s32.totalorder %s749_s17, 1  ;;  %p750_p5 = scmp.ge.s32.totalorder %s1092_s15, 1 }
   0xa   : > { %p1154_p4 = por %p1369_p1, %p42_p0  ;;  %p126_p7 = scmp.lt.s32.totalorder %s1092_s15, 3 }
   0xb   : > { %p1159_p6 = por %p119_p3, %p42_p0  ;;  %s1094_s21 = smov [#allocation7]  }
   0xc   : > { %s1373_s18 = scalar_select %p1154_p4, 1, 0 }
   0xd   : > { %s1374_s19 = scalar_select %p1159_p6, 1, 0 }
   0xe   : > { %p1164_p8 = pnand %p750_p5, %p126_p7  ;;  %s138_s22 = sshll.u32 %s1094_s21, 4  ;;  %s1168_s22 = int_to_ptr.vmem [resolvable:$true] %s138_s22 }
   0xf   : > { %s1180_s24 = sadd.s32 1, %s1092_s15   ;;  %s29_s25 = sadd.s32 1, %s1088_s14 }
  0x10   : > { %s1375_s20 = scalar_select %p1164_p8, 1, 0 }
  0x11   : > { %p872_p9 = pneg %p1164_p8  ;;  %s26_s26 = ssub.s32 %s1092_s15, %s1180_s24 }
  0x12   : > { %s930_s29 = scalar_lea.hbm %s1367_s2, 512 }
  0x13   : > { %p1175_p11 = pnand %p872_p9, %p1369_p1  ;;  %p931_p12 = scmp.ne.s32.totalorder %s1367_s2, %s930_s29 }
  0x14   : > { %p937_p5 = scmp.lt.u32.totalorder %s930_s29, %s1367_s2 }
  0x15   : > { %p932_p13 = pneg %p1175_p11 }
  0x17   : > { %p933_p0 = pnand %p932_p13, %p931_p12 }
  0x19   : > { %p934_p3 = pneg %p933_p0 }
  0x1b   : > { %p939_p7 = pnand %p937_p5, %p934_p3 }
  0x1d   : > { %942 = shalt.err (!%p939_p7)
}
  0x1e   : > { %s943_s7 = scalar_lea.vmem %s1168_s22, 512  ;;  %p951_p2 = scmp.lt.s32.totalorder %s1168_s22, %s1168_s22 }
  0x1f   : > { %p944_p9 = scmp.ne.s32.totalorder %s1168_s22, %s943_s7  ;;  %p952_p6 = scmp.lt.s32.totalorder %s943_s7, %s943_s7 }
  0x21   : > { %p946_p10 = pnand %p944_p9, %p932_p13  ;;  %p953_p4 = por %p952_p6, %p951_p2 }
  0x23   : > { %p947_p1 = pneg %p946_p10 }
  0x25   : > { %p954_p8 = pnand %p953_p4, %p947_p1 }
  0x27   : > { %957 = shalt.err (!%p954_p8)
}
  0x28   : > { %s1095_s8 = smov 128   ;;  %s1096_s9 = smov 8  }
  0x29   : > { %875 = dma.hbm_to_vmem [thread:$0]  (!%p1175_p11), %s1367_s2, 512, %s1168_s22, [#allocation6], %s1095_s8, %s1095_s8, %s1096_s9  }
  0x2a   : > { %p27_p2 = scmp.eq.s32.totalorder %s26_s26, 0  ;;  %p36_p1 = scmp.ne.s32.totalorder %s1088_s14, %s1084_s13 }
  0x2b   : > { %p37_p4 = scmp.eq.s32.totalorder %s1092_s15, 0  ;;  %p888_p6 = scmp.lt.s32.totalorder %s1092_s15, 2 }
  0x2c   : > { %s1211_s17 = scalar_select %p27_p2, %s1088_s14, %s29_s25  }
  0x2d   : > { %p38_p8 = por %p37_p4, %p36_p1  ;;  %p1377_p10 = scmp.eq.s32.totalorder %s1145_s16, 1 }
  0x2e   : > { %s152_s27 = sand.u32 1, %s1088_s14   ;;  %s754_s28 = sshll.u32 %s1092_s15, 7 }
  0x2f   : > { %p1215_p12 = por %p1377_p10, %p36_p1  ;;  %s1221_s29 = sshll.u32 %s152_s27, 3 }
  0x30   : > { %s1226_s22 = scalar_lea.hbm %s1365_s0, %s754_s28  ;;  %s156_s25 = scalar_lea.vmem [#allocation2], %s1221_s29 }
  0x31   : > { %s1378_s21 = scalar_select %p1215_p12, 1, 0 }
  0x32   : > { %s163_s26 = sshll.u32 %s156_s25, 4  ;;  %p1229_p11 = pnand %p888_p6, %p38_p8  ;;  %s1233_s26 = int_to_ptr.vmem [resolvable:$true] %s163_s26 }
  0x33   : > { %s1238_s7 = scalar_lea.hbm %s1366_s1, %s754_s28  ;;  %s153_s8 = scalar_lea.sflag [#allocation3], %s152_s27 }
  0x34   : > { %s958_s9 = scalar_lea.hbm %s1226_s22, 128  ;;  %p960_p0 = pneg %p1229_p11 }
  0x35   : > { %p959_p13 = scmp.ne.s32.totalorder %s1226_s22, %s958_s9  ;;  %s963_s23 = scalar_lea.hbm %s1365_s0, 256 }
  0x36   : > { %p964_p7 = scmp.lt.u32.totalorder %s1226_s22, %s1365_s0  ;;  %p965_p9 = scmp.lt.u32.totalorder %s963_s23, %s958_s9 }
  0x37   : > { %p961_p3 = pnand %p960_p0, %p959_p13  ;;  %p967_p1 = scmp.lt.u32.totalorder %s958_s9, %s1226_s22 }
  0x38   : > { %p966_p2 = por %p965_p9, %p964_p7 }
  0x39   : > { %p962_p5 = pneg %p961_p3 }
  0x3a   : > { %p968_p4 = por %p967_p1, %p966_p2 }
  0x3c   : > { %p969_p6 = pnand %p968_p4, %p962_p5 }
  0x3e   : > { %972 = shalt.err (!%p969_p6)
}
  0x3f   : > { %s973_s27 = scalar_lea.vmem %s1233_s26, 128  ;;  %s1097_s28 = smov [#allocation2]  }
  0x40   : > { %p974_p8 = scmp.ne.s32.totalorder %s1233_s26, %s973_s27  ;;  %s978_s5 = sshll.u32 %s1097_s28, 4  ;;  %s979_s5 = int_to_ptr.vmem [resolvable:$false] %s978_s5 }
  0x41   : > { %s980_s6 = scalar_lea.vmem %s979_s5, 256  ;;  %p981_p3 = scmp.lt.s32.totalorder %s1233_s26, %s979_s5 }
  0x42   : > { %p976_p10 = pnand %p974_p8, %p960_p0  ;;  %p982_p7 = scmp.lt.s32.totalorder %s980_s6, %s973_s27 }
  0x44   : > { %p977_p13 = pneg %p976_p10  ;;  %p983_p9 = por %p982_p7, %p981_p3 }
  0x46   : > { %p984_p2 = pnand %p983_p9, %p977_p13 }
  0x48   : > { %987 = shalt.err (!%p984_p2)
}
  0x49   : > { %879 = dma.hbm_to_vmem [thread:$0]  (!%p1229_p11), %s1226_s22, 128, %s1233_s26, %s153_s8  }
  0x4a   : > { %s170_s9 = sand.u32 1, %s1092_s15   ;;  %s174_s10 = scalar_lea.vmem [#allocation5], %s1221_s29 }
  0x4b   : > { %s181_s11 = sshll.u32 %s174_s10, 4  ;;  %s171_s23 = scalar_lea.sflag [#allocation6], %s170_s9  ;;  %s182_s11 = int_to_ptr.vmem [resolvable:$true] %s181_s11 }
  0x4c   : > { %s988_s30 = scalar_lea.hbm %s1238_s7, 128  ;;  %s993_s28 = scalar_lea.hbm %s1366_s1, 256 }
  0x4d   : > { %p989_p5 = scmp.ne.s32.totalorder %s1238_s7, %s988_s30  ;;  %p994_p6 = scmp.lt.u32.totalorder %s1238_s7, %s1366_s1 }
  0x4e   : > { %p995_p8 = scmp.lt.u32.totalorder %s993_s28, %s988_s30  ;;  %p997_p13 = scmp.lt.u32.totalorder %s988_s30, %s1238_s7 }
  0x4f   : > { %p991_p1 = pnand %p989_p5, %p960_p0 }
  0x50   : > { %p996_p10 = por %p995_p8, %p994_p6 }
  0x51   : > { %p992_p4 = pneg %p991_p1 }
  0x52   : > { %p998_p3 = por %p997_p13, %p996_p10 }
  0x54   : > { %p999_p7 = pnand %p998_p3, %p992_p4 }
  0x56   : > { %1002 = shalt.err (!%p999_p7)
}
  0x57   : > { %s1003_s29 = scalar_lea.vmem %s182_s11, 128  ;;  %s1098_s22 = smov [#allocation5]  }
  0x58   : > { %p1004_p9 = scmp.ne.s32.totalorder %s182_s11, %s1003_s29  ;;  %s1008_s26 = sshll.u32 %s1098_s22, 4  ;;  %s1009_s26 = int_to_ptr.vmem [resolvable:$false] %s1008_s26 }
  0x59   : > { %s1010_s8 = scalar_lea.vmem %s1009_s26, 256  ;;  %p1011_p1 = scmp.lt.s32.totalorder %s182_s11, %s1009_s26 }
  0x5a   : > { %p1006_p2 = pnand %p1004_p9, %p960_p0  ;;  %p1012_p12 = scmp.lt.s32.totalorder %s1010_s8, %s1003_s29 }
  0x5c   : > { %p1007_p5 = pneg %p1006_p2  ;;  %p1013_p6 = por %p1012_p12, %p1011_p1 }
  0x5e   : > { %p1014_p8 = pnand %p1013_p6, %p1007_p5 }
  0x60   : > { %1017 = shalt.err (!%p1014_p8)
}
  0x61   : > { %882 = dma.hbm_to_vmem [thread:$0]  (!%p1229_p11), %s1238_s7, 128, %s182_s11, %s171_s23  }
  0x62   : > { %p1380_p4 = scmp.ne.s32.totalorder %s1375_s20, 0 }
  0x63   : > { %s1289_s9 = sand.u32 (!%p1380_p4), 1, %s1084_s13   ;;  %p1381_p0 = scmp.ne.s32.totalorder (!%p1380_p4), %s1373_s18, 0 }
  0x64   : > { %190 = sbr.rel (%p1380_p4) target bundleno = 581 (0x245), region = 32  ;;  %s758_s10 = sshll.u32 (!%p1380_p4), %s1289_s9, 3 }
  0x65   : > { %s193_s30 = scalar_lea.sflag (!%p1380_p4), [#allocation3], %s1289_s9  ;;  %s196_s25 = scalar_lea.vmem (!%p1380_p4), [#allocation2], %s758_s10 }
  0x6b   : > { %1063 = dma.done.wait (%p1381_p0), %s193_s30, 128  }
  0x6c   : > { %1065 = vsyncadd (%p1381_p0), %s193_s30, 4294967168  ;;  %s201_s4 = sand.u32 1, %s1145_s16   ;;  %s205_s20 = scalar_lea.vmem [#allocation5], %s758_s10 }
  0x6d   : > { %s202_s7 = scalar_lea.sflag [#allocation6], %s201_s4 }
  0x6e   : > { %1067 = dma.done.wait (%p1381_p0), %s202_s7, 128  }
  0x6f   : > { %1069 = vsyncadd (%p1381_p0), %s202_s7, 4294967168  ;;  %p1382_p12 = scmp.eq.s32.totalorder %s1145_s16, 0 }
  0x71   : > { %1071 = dma.done.wait (%p1382_p12), [#allocation6], 512   ;;  %p1383_p11 = pmov %p1382_p12 }
  0x72   : > { %v1099_v0 = vmov 0.0|0.0   ;;  %vm1100_vm0 = vmmov 0   ;;  %v1101_v1 = vmov 0.0   ;;  %v238_v2 = vld [vmem:[#allocation7] sm:$0xff]  ;;  %v239_v3 = vld [vmem:[#allocation7 + $0x8] sm:$0xff]  ;;  %v241_v5 = vld [vmem:[#allocation7 + $0x10] sm:$0xff]  ;;  %v400_v10 = vlaneseq }
  0x73   : > { %1073 = vsyncadd (%p1383_p11), [#allocation6], 4294966784  ;;  %841 = vmatprep.subr.bf16.mxu1 %v1099_v0  ;;  %808 = vmatprep.mubr.msk.f32.mxu1 %vm1100_vm0, %v1101_v1  ;;  %v842_v4 = vpack.c.bf16 %v239_v3, %v238_v2  ;;  %v242_v6 = vld [vmem:[#allocation7 + $0x18] sm:$0xff]  ;;  %v236_v7 = vld [vmem:[%s196_s25] sm:$0xff]  ;;  %vm243_vm1 = vcmask 130048   ;;  %s784_s18 = sshll.u32 %s1145_s16, 4 }
  0x74   : > { %847 = vmatprep.subr.bf16.mxu0 %v1099_v0  ;;  %838 = vmatprep.mubr.msk.f32.mxu0 %vm1100_vm0, %v1101_v1  ;;  %v845_v8 = vpack.c.bf16 %v242_v6, %v241_v5  ;;  %v237_v9 = vld [vmem:[%s205_s20] sm:$0xff]  ;;  %v401_v11 = vshrl.u32 %v400_v10, 7  ;;  %v412_v13 = vand.u32 127, %v400_v10  ;;  %v1102_v18 = vmov 1.0|1.0   ;;  %s235_s11 = scalar_lea.vmem [#allocation8], %s1289_s9  ;;  %s1321_s5 = scalar_lea.hbm %s1368_s3, %s784_s18 }
  0x75   : > { %843 = vmatpush3.bf16.msra.mxu1 %v842_v4  ;;  %s651_s23 = sshll.u32 %s235_s11, 4  ;;  %s639_s6 = scalar_lea.sflag [#allocation4], %s1289_s9  ;;  %s1323_s23 = int_to_ptr.vmem [resolvable:$true] %s651_s23 }
  0x76   : > { %844 = vmatprep.subr.bf16.mxu1 %v1099_v0  ;;  %v402_v12 = vadd.s32 8, %v401_v11  ;;  %v417_v14 = vand.u32 7, %v401_v11  ;;  %v403_v16 = vadd.s32 16, %v401_v11  ;;  %v404_v17 = vadd.s32 24, %v401_v11  ;;  %s1018_s29 = scalar_lea.vmem %s1323_s23, 16  ;;  %p1384_p13 = scmp.ne.s32.totalorder %s1378_s21, 0 }
  0x77   : > { %v405_v21 = vadd.s32 32, %v401_v11  ;;  %v406_v22 = vadd.s32 40, %v401_v11  ;;  %v407_v25 = vadd.s32 48, %v401_v11  ;;  %v408_v26 = vadd.s32 56, %v401_v11  ;;  %p1019_p10 = scmp.ne.s32.totalorder %s1323_s23, %s1018_s29  ;;  %s1103_s16 = smov [#allocation8]  }
  0x78   : > { %809 = vmatmul.mubr.msk.f32.vlgmr.msra.gmra.mrb[0].mxu1 %vm243_vm1, %v236_v7  ;;  %v424_v15 = vand.u32 7, %v402_v12  ;;  %vm533_vm2 = vcmp.eq.s32.totalorder %v417_v14, %v412_v13  ;;  %v431_v19 = vand.u32 7, %v403_v16  ;;  %v438_v20 = vand.u32 7, %v404_v17  ;;  %s1022_s22 = sshll.u32 %s1103_s16, 4  ;;  %s1023_s22 = int_to_ptr.vmem [resolvable:$false] %s1022_s22 }
  0x79   : > { %846 = vmatpush3.bf16.msra.mxu1 %v845_v8  ;;  %815 = vmatprep.mubr.msk.f32.mxu1 %vm1100_vm0, %v1101_v1  ;;  %v445_v23 = vand.u32 7, %v405_v21  ;;  %v452_v24 = vand.u32 7, %v406_v22  ;;  %v409_v27 = vadd.s32 64, %v401_v11  ;;  %v410_v28 = vadd.s32 72, %v401_v11  ;;  %p1020_p3 = pnand %p1019_p10, %p1384_p13  ;;  %s1024_s26 = scalar_lea.vmem %s1023_s22, 32 }
  0x7a   : > { %vm534_vm3 = vcmp.eq.s32.totalorder %v424_v15, %v412_v13  ;;  %vm535_vm5 = vcmp.eq.s32.totalorder %v431_v19, %v412_v13  ;;  %vm536_vm6 = vcmp.eq.s32.totalorder %v438_v20, %v412_v13  ;;  %v459_v29 = vand.u32 7, %v407_v25  ;;  %p1025_p9 = scmp.lt.s32.totalorder %s1323_s23, %s1023_s22  ;;  %p1026_p2 = scmp.lt.s32.totalorder %s1024_s26, %s1018_s29 }
  0x7b   : > { %vm848_vm4 = vmpackc.low %vm534_vm3, %vm533_vm2  ;;  %vm537_vm8 = vcmp.eq.s32.totalorder %v445_v23, %v412_v13  ;;  %vm538_vm9 = vcmp.eq.s32.totalorder %v452_v24, %v412_v13  ;;  %v466_v30 = vand.u32 7, %v408_v26  ;;  %v473_v31 = vand.u32 7, %v409_v27  ;;  %p1021_p7 = pneg %p1020_p3 }
  0x7c   : > { %816 = vmatmul.mubr.msk.f32.vlgmr.msra.gmra.mrb[2].mxu1 %vm243_vm1, %v237_v9  ;;  %849 = vmatpush3.bf16.msk.msra.mxu0 %vm848_vm4, %v1102_v18  ;;  %vm851_vm7 = vmpackc.low %vm536_vm6, %vm535_vm5  ;;  %v480_v32 = vand.u32 7, %v410_v28  ;;  %vm539_vm11 = vcmp.eq.s32.totalorder %v459_v29, %v412_v13  ;;  %vm392_vm1 = vcmask 654336   ;;  %p1027_p5 = por %p1026_p2, %p1025_p9 }
  0x7d   : > { %850 = vmatprep.subr.bf16.mxu0 %v1099_v0  ;;  %vm854_vm10 = vmpackc.low %vm538_vm9, %vm537_vm8  ;;  %vm540_vm12 = vcmp.eq.s32.totalorder %v466_v30, %v412_v13  ;;  %vm541_vm14 = vcmp.eq.s32.totalorder %v473_v31, %v412_v13 }
  0x7e   : > { %vm857_vm13 = vmpackc.low %vm540_vm12, %vm539_vm11  ;;  %vm542_vm15 = vcmp.eq.s32.totalorder %v480_v32, %v412_v13  ;;  %p1028_p1 = pnand %p1027_p5, %p1021_p7 }
  0x7f   : > { %vm860_vm0 = vmpackc.low %vm542_vm15, %vm541_vm14 }
  0x80   : > { %852 = vmatpush3.bf16.msk.msra.mxu0 %vm851_vm7, %v1102_v18 }
  0x81   : > { %853 = vmatprep.subr.bf16.mxu0 %v1099_v0 }
  0x84   : > { %855 = vmatpush3.bf16.msk.msra.mxu0 %vm854_vm10, %v1102_v18 }
  0x85   : > { %856 = vmatprep.subr.bf16.mxu0 %v1099_v0 }
  0x88   : > { %858 = vmatpush3.bf16.msk.msra.mxu0 %vm857_vm13, %v1102_v18 }
  0x89   : > { %859 = vmatprep.subr.bf16.mxu0 %v1099_v0 }
  0x8c   : > { %861 = vmatpush3.bf16.msk.msra.mxu0 %vm860_vm0, %v1102_v18 }
 0x14b   : > { %v313_v33 = vpop.f32.mrb[0].mxu1 }
 0x14c   : > { %v810_v34 = vpop.f32.mrb[1].mxu1 }
 0x14f   : > { %v386_v35 = vpop.f32.mrb[2].mxu1 }
 0x150   : > { %v390_v36 = vadd.f32 %v386_v35, %v313_v33  ;;  %v817_v37 = vpop.f32.mrb[3].mxu1 }
 0x152   : > { %v391_v38 = vmul.f32 %v390_v36, %v313_v33 }
 0x154   : > { %v393_v39 = vsel %vm392_vm1, %v391_v38, 0.0 }
 0x155   : > { %v394_v40 = vrot.slane %v393_v39, 4 }
 0x157   : > { %v395_v41 = vadd.f32 %v394_v40, %v393_v39 }
 0x159   : > { %v396_v42 = vrot.slane %v395_v41, 2 }
 0x15b   : > { %v397_v43 = vadd.f32 %v396_v42, %v395_v41 }
 0x15d   : > { %v398_v44 = vrot.slane %v397_v43, 1 }
 0x15f   : > { %v399_v45 = vadd.f32 %v398_v44, %v397_v43 }
 0x161   : > { %839 = vmatmul.mubr.msk.f32.vlgmr.msra.gmra.mrb[0].mxu0 %vm392_vm1, %v399_v45 }
 0x234   : > { %v632_v46 = vpop.f32.mrb[0].mxu0 }
 0x235   : > { %v636_v47 = vmul.f32 0.00625, %v632_v46  ;;  %v840_v48 = vpop.f32.mrb[1].mxu0 }
 0x237   : > { %637 = vst [vmem:[%s235_s11] sm:$0x1] %v636_v47 }
 0x238   : > { %1031 = shalt.err (!%p1028_p1)
}
 0x239   : > { %s1032_s8 = scalar_lea.hbm %s1321_s5, 16  ;;  %s1036_s30 = scalar_lea.hbm %s1368_s3, 32 }
 0x23a   : > { %p1033_p6 = scmp.ne.s32.totalorder %s1321_s5, %s1032_s8  ;;  %p1037_p0 = scmp.lt.u32.totalorder %s1321_s5, %s1368_s3 }
 0x23b   : > { %p1038_p12 = scmp.lt.u32.totalorder %s1036_s30, %s1032_s8  ;;  %p1040_p10 = scmp.lt.u32.totalorder %s1032_s8, %s1321_s5 }
 0x23c   : > { %p1034_p8 = pnand %p1033_p6, %p1384_p13 }
 0x23d   : > { %p1039_p11 = por %p1038_p12, %p1037_p0 }
 0x23e   : > { %p1035_p4 = pneg %p1034_p8 }
 0x23f   : > { %p1041_p3 = por %p1040_p10, %p1039_p11 }
 0x241   : > { %p1042_p7 = pnand %p1041_p3, %p1035_p4 }
 0x243   : > { %1045 = shalt.err (!%p1042_p7)
}
 0x244   : > { %870 = dma.vmem_to_hbm [thread:$0]  (%p1384_p13), %s1323_s23, 16, %s1321_s5, %s639_s6  }
 0x245 PF: > { %s663_s7 = sand.u32 1, %s1080_s12   ;;  %p1385_p9 = scmp.ne.s32.totalorder %s1374_s19, 0 }
 0x246   : > { %p1386_p2 = scmp.ge.s32.totalorder %s1092_s15, 2  ;;  %s664_s20 = scalar_lea.sflag [#allocation4], %s663_s7 }
 0x248   : > { %p884_p5 = pnand %p1386_p2, %p1385_p9 }
 0x24a   : > { %1075 = dma.done.wait (!%p884_p5), %s664_s20, 16  }
 0x24b   : > { %1077 = vsyncadd (!%p884_p5), %s664_s20, 4294967280  ;;  %p19_p1 = scmp.ge.s32.totalorder %s1180_s24, 4   ;;  %s1387_s12 = smov %s1084_s13 }
 0x24c   : > { %s1388_s13 = smov %s1088_s14  ;;  %s1389_s14 = smov %s1211_s17 }
 0x24d   : > { %s1390_s15 = smov %s1180_s24  ;;  %21 = sbr.rel (!%p19_p1) target bundleno = 7 (0x7), region = 95 }
 0x254   :  { %668 = vsyncpa [#allocation3], 1 }
 0x255   :  { %670 = vsyncpa [#allocation3 + $0x1], 1 }
 0x256   :  { %671 = vsyncpa [#allocation6], 1 }
 0x257   :  { %673 = vsyncpa [#allocation6 + $0x1], 1 }
 0x258   :  { %674 = vsyncpa [#allocation4], 1 }
 0x259   :  { %676 = vsyncpa [#allocation4 + $0x1], 1 }

</bundles_post_ra>
